<compile_context>
chip_gen: v6e
topology: v6e:2x2x1
jax: 0.10.0
libtpu: 0.0.40
codegen_flags: <defaults>
</compile_context>

<pallas_src>
import functools
import math

import jax
import jax.numpy as jnp
from jax.experimental import pallas as pl
from jax.experimental.pallas import tpu as pltpu


# ----------------------------- hardware detection -----------------------------
def _detect_vmem_capacity_bytes():
    try:
        info = pltpu.get_tpu_info()
        cap = getattr(info, "vmem_capacity_bytes", None)
        if cap:
            return int(cap)
    except Exception:
        pass
    kind = ""
    try:
        kind = jax.devices()[0].device_kind.lower()
    except Exception:
        pass
    if "v7" in kind:
        return 64 << 20
    if "v5" in kind or "v6" in kind:
        return 128 << 20
    return 64 << 20          # conservative default


def _vmem_limit_bytes():
    cap = _detect_vmem_capacity_bytes()
    return int(min((cap * 3) // 4, 96 << 20))    # 96 MiB on 128 MiB parts, 48 MiB on 64 MiB


def _is_v5():
    try:
        return "v5" in jax.devices()[0].device_kind.lower()
    except Exception:
        return False


# ----------------------------- batch-tile chooser ------------------------------
def _choose_batch_tile(B, N, F, D, A, *, bu_itemsize, h_itemsize, out_itemsize,
                       vmem_limit_bytes, alpha_sum_on_mxu):
    # Resident bf16 weights + f32 biases; the pipeline still allocates 2 buffers each.
    weight_bytes = 2 * (2 * (F * A + 2 * D * A + D * F) + 4 * (3 * A + F))
    headroom = 6 << 20                              # compiler-internal scratch / regalloc slack
    avail = vmem_limit_bytes - weight_bytes - headroom

    per_row = 2 * N * F * bu_itemsize               # bu stream (double-buffered)
    per_row += 2 * 2 * D * h_itemsize               # h1 + sent streams
    per_row += 2 * F * out_itemsize                 # output stream
    per_row += 3 * N * A * 4                        # f32 (N, A) intermediates (proj / relu / *watt)
    per_row += (2 * A + 2 * F + 8 * N) * 4          # small f32 temps (logits, alphas, row sums)
    if not alpha_sum_on_mxu:
        per_row += N * F * 4                        # VPU alpha-sum materializes an f32 (N, F) temp

    rows = max(int(avail) // max(per_row, 1), 1)
    if rows >= B:
        tb = B
    else:
        tb = max(8, (rows // 8) * 8)
    tb = min(tb, 1024)
    if B >= 16:                                     # >= 2 grid steps: lets the "parallel" batch
        cap = (((B + 1) // 2) + 7) // 8 * 8         # axis shard across both TCs on v7x
        tb = min(tb, max(8, cap))
    return int(min(tb, B))                          # tb == B, or a multiple of 8


# ----------------------------------- kernel ------------------------------------
def adap_att_kernel(bu_ref, h1_ref, sent_ref,
                    wf_ref, wd_ref, ws_ref, wws_ref,      # bf16 weights (full-array resident)
                    bdf_ref, bds_ref, bws_ref, watt_ref,  # f32 folded biases / att weight row
                    out_ref, *, alpha_sum_on_mxu):
    TB, N, F = bu_ref.shape

    bu = bu_ref[...].astype(jnp.bfloat16)                  # (TB, N, F)
    h1 = h1_ref[...].astype(jnp.bfloat16)                  # (TB, D)
    sent = sent_ref[...].astype(jnp.bfloat16)              # (TB, D)
    watt = watt_ref[...]                                   # (1, A) f32

    # ---- projections on the MXU (bf16 operands, f32 accumulation) ----
    h1wd = jnp.dot(h1, wd_ref[...], preferred_element_type=jnp.float32)          # (TB, A), reused
    img_proj = jnp.dot(bu.reshape(TB * N, F), wf_ref[...],
                       preferred_element_type=jnp.float32).reshape(TB, N, -1)    # (TB, N, A)
    sent_proj = jnp.dot(sent, ws_ref[...], preferred_element_type=jnp.float32)   # (TB, A)

    # ---- attention logits (dropout = identity in eval mode; batt dropped: softmax-invariant) ----
    att1 = jnp.maximum((h1wd + bdf_ref[...])[:, None, :] + img_proj, 0.0)        # (TB, N, A)
    attention_img = jnp.sum(att1 * watt, axis=-1)                                # (TB, N)
    sent1 = jnp.maximum(h1wd + sent_proj + bds_ref[...], 0.0)                    # (TB, A)
    sentinel_att = jnp.sum(sent1 * watt, axis=-1, keepdims=True)                 # (TB, 1)

    # ---- softmax over concat([attention_img, sentinel_att]) without materializing the concat ----
    m = jnp.maximum(jnp.max(attention_img, axis=-1, keepdims=True), sentinel_att)
    e_img = jnp.exp(attention_img - m)                                           # (TB, N)
    e_sent = jnp.exp(sentinel_att - m)                                           # (TB, 1)
    inv = pl.reciprocal(jnp.sum(e_img, axis=-1, keepdims=True) + e_sent, approx=True)
    alpha_img = e_img * inv                                                      # (TB, N)
    alpha_sent = e_sent * inv                                                    # (TB, 1)

    # ---- sentinel contribution: weight_sent(sent * alpha_sent) ----
    aw_sent = jnp.dot((sent.astype(jnp.float32) * alpha_sent).astype(jnp.bfloat16),
                      wws_ref[...], preferred_element_type=jnp.float32) + bws_ref[...]   # (TB, F)

    # ---- alpha-weighted feature sum ----
    if alpha_sum_on_mxu:       # v6e/v7x: HBM-bound, MXU contraction is free filler
        aw_img = jnp.einsum("bqn,bnf->bqf",
                            alpha_img[:, None, :].astype(jnp.bfloat16), bu,
                            preferred_element_type=jnp.float32)[:, 0, :]                 # (TB, F)
    else:                      # v5e: MXU-bound, keep this off the MXU (VPU mul + sublane reduce)
        aw_img = jnp.sum(alpha_img[:, :, None] * bu, axis=1)                             # (TB, F)

    out_ref[...] = (aw_img + aw_sent).astype(out_ref.dtype)


# ------------------------------------ wrapper -----------------------------------
def adap_att_module(bu_feats, h1, sent, params, out_dtype=jnp.float32):
    B, N, F = bu_feats.shape
    D = h1.shape[1]
    A = params["wd"].shape[1]

    bf16, f32 = jnp.bfloat16, jnp.float32

    # Small per-call weight prep (negligible vs. the bu stream).  bf folds into the decoder
    # bias so the big (TB*N, A) intermediate needs no bias pass; batt is dropped entirely.
    wf = params["wf"].astype(bf16)                            # (F, A)
    wd = params["wd"].astype(bf16)                            # (D, A)
    ws = params["ws"].astype(bf16)                            # (D, A)
    wws = params["wws"].astype(bf16)                          # (D, F)
    bdf = (params["bd"] + params["bf"]).astype(f32)           # (1, A)  bd + bf
    bds = (params["bd"] + params["bs"]).astype(f32)           # (1, A)  bd + bs
    bws = params["bws"].astype(f32)                           # (1, F)
    watt = params["watt"].astype(f32)                         # (1, A)

    vmem_limit = _vmem_limit_bytes()
    alpha_sum_on_mxu = not _is_v5()
    TB = _choose_batch_tile(
        B, N, F, D, A,
        bu_itemsize=jnp.dtype(bu_feats.dtype).itemsize,
        h_itemsize=jnp.dtype(h1.dtype).itemsize,
        out_itemsize=jnp.dtype(out_dtype).itemsize,
        vmem_limit_bytes=vmem_limit,
        alpha_sum_on_mxu=alpha_sum_on_mxu)

    def batch_tiled(shape):
        zeros = (0,) * (len(shape) - 1)
        return pl.BlockSpec(shape, lambda b: (b,) + zeros)

    def resident(x):   # same block every step -> fetched once, stays in VMEM
        zeros = (0,) * x.ndim
        return pl.BlockSpec(x.shape, lambda b: zeros)

    kernel = functools.partial(adap_att_kernel, alpha_sum_on_mxu=alpha_sum_on_mxu)

    return pl.pallas_call(
        kernel,
        out_shape=jax.ShapeDtypeStruct((B, F), out_dtype),
        grid_spec=pltpu.PrefetchScalarGridSpec(
            num_scalar_prefetch=0,
            grid=(pl.cdiv(B, TB),),
            in_specs=[
                batch_tiled((TB, N, F)),            # bu_feats: streamed as-is, no pad/cast copy
                batch_tiled((TB, D)),               # h1
                batch_tiled((TB, D)),               # sent
                resident(wf), resident(wd), resident(ws), resident(wws),
                resident(bdf), resident(bds), resident(bws), resident(watt),
            ],
            out_specs=batch_tiled((TB, F)),
        ),
        compiler_params=pltpu.CompilerParams(
            dimension_semantics=("parallel",),      # batch tiles independent (2 TCs on v7x)
            vmem_limit_bytes=vmem_limit,
        ),
    )(bu_feats, h1, sent, wf, wd, ws, wws, bdf, bds, bws, watt)


# -------------------- deterministic weight-norm linear init ---------------------
def weight_norm_linear(key, in_f, out_f):
    """Returns (W_T, b) with W = g * v / ||v||_2 (per output row, like torch weight_norm dim=0)."""
    k_v, k_g, k_b = jax.random.split(key, 3)
    bound = 1.0 / math.sqrt(in_f)
    v = jax.random.uniform(k_v, (out_f, in_f), jnp.float32, -bound, bound)
    g = jax.random.uniform(k_g, (out_f, 1), jnp.float32, 0.5, 1.5)
    b = jax.random.uniform(k_b, (out_f,), jnp.float32, -bound, bound)
    w = g * v / jnp.linalg.norm(v, axis=1, keepdims=True)      # (out, in)
    return w.T, b.reshape(1, out_f)                            # (in, out), (1, out)


# ------------------------------ pure-JAX reference -------------------------------
def ref_forward(bu, h1, sent, p):
    h1_att = h1 @ p["wd"] + p["bd"][0]
    img_att = jnp.einsum("bnf,fa->bna", bu, p["wf"]) + p["bf"][0]
    sent_att = sent @ p["ws"] + p["bs"][0]
    att1 = jax.nn.relu(h1_att[:, None, :] + img_att)
    attention_img = jnp.einsum("bna,a->bn", att1, p["watt"][0]) + p["batt"][0, 0]
    sent1 = jax.nn.relu(sent_att + h1_att)
    sentinel_att = sent1 @ p["watt"][0] + p["batt"][0, 0]
    attention = jnp.concatenate([attention_img, sentinel_att[:, None]], axis=1)
    sig = jax.nn.softmax(attention, axis=1)
    aw_sentinel = (sent * sig[:, -1:]) @ p["wws"] + p["bws"][0]
    aw_images = jnp.sum(bu * sig[:, :-1][:, :, None], axis=1) + aw_sentinel
    return aw_images


# ------------------------------------- main --------------------------------------
if __name__ == "__main__":
    B, N = 2, 8
    featureSize, decodeSize, attSize = 32, 32, 32

    key = jax.random.PRNGKey(0)
    keys = jax.random.split(key, 8)

    bu_feats = jax.random.normal(keys[0], (B, N, featureSize), jnp.float32)
    h1 = jax.random.normal(keys[1], (B, decodeSize), jnp.float32)
    sent = jax.random.normal(keys[2], (B, decodeSize), jnp.float32)

    wf, bf = weight_norm_linear(keys[3], featureSize, attSize)        # att_feat
    wd, bd = weight_norm_linear(keys[4], decodeSize, attSize)         # att_decoder
    ws, bs = weight_norm_linear(keys[5], decodeSize, attSize)         # att_sent
    wws, bws = weight_norm_linear(keys[6], decodeSize, featureSize)   # weight_sent
    watt_t, batt = weight_norm_linear(keys[7], attSize, 1)            # att (out=1)

    params = dict(
        wf=wf, bf=bf, wd=wd, bd=bd, ws=ws, bs=bs, wws=wws, bws=bws,
        watt=watt_t.T,                 # (1, attSize)
        batt=batt.reshape(1, 1),       # (1, 1)  (softmax-invariant; kernel drops it)
    )

    # Quantize matmul operands to bf16 once so the kernel and the f32 reference see identical
    # inputs; remaining deltas are accumulation order, approx reciprocal, and alpha bf16 casts.
    qz = lambda x: x.astype(jnp.bfloat16).astype(jnp.float32)
    bu_q, h1_q, sent_q = qz(bu_feats), qz(h1), qz(sent)
    params_q = dict(params)
    for k in ("wf", "wd", "ws", "wws"):
        params_q[k] = qz(params[k])

    # Producer emits bf16 activations -> the wrapper performs no pad/cast copy of bu.
    out = adap_att_module(bu_q.astype(jnp.bfloat16),
                          h1_q.astype(jnp.bfloat16),
                          sent_q.astype(jnp.bfloat16),
                          params_q)
    out = jax.block_until_ready(out)

    ref = ref_forward(bu_q, h1_q, sent_q, params_q)
    assert out.shape == (B, featureSize)
    assert jnp.allclose(out, ref, atol=2e-2, rtol=2e-2), "mismatch vs reference"

    print("KERNEL_OK")
</pallas_src>

<mosaic_0001>
module attributes {stable_mosaic.version = 11 : i64} {
  func.func @adap_att_kernel(%arg0: i32, %arg1: memref<2x8x32xbf16, #tpu.memory_space<vmem>>, %arg2: memref<2x32xbf16, #tpu.memory_space<vmem>>, %arg3: memref<2x32xbf16, #tpu.memory_space<vmem>>, %arg4: memref<32x32xbf16, #tpu.memory_space<vmem>>, %arg5: memref<32x32xbf16, #tpu.memory_space<vmem>>, %arg6: memref<32x32xbf16, #tpu.memory_space<vmem>>, %arg7: memref<32x32xbf16, #tpu.memory_space<vmem>>, %arg8: memref<1x32xf32, #tpu.memory_space<vmem>>, %arg9: memref<1x32xf32, #tpu.memory_space<vmem>>, %arg10: memref<1x32xf32, #tpu.memory_space<vmem>>, %arg11: memref<1x32xf32, #tpu.memory_space<vmem>>, %arg12: memref<2x32xf32, #tpu.memory_space<vmem>>) attributes {dimension_semantics = [#tpu.dimension_semantics<parallel>], iteration_bounds = array<i64: 1>, scalar_prefetch = 0 : i64, scratch_operands = 0 : i64, tpu.core_type = #tpu.core_type<tc>, window_params = [{transform_indices = @transform_0, window_bounds = array<i64: 2, 8, 32>}, {transform_indices = @transform_1, window_bounds = array<i64: 2, 32>}, {transform_indices = @transform_2, window_bounds = array<i64: 2, 32>}, {pipeline_mode = #tpu.pipeline_mode<synchronous>, transform_indices = @transform_3, window_bounds = array<i64: 32, 32>}, {pipeline_mode = #tpu.pipeline_mode<synchronous>, transform_indices = @transform_4, window_bounds = array<i64: 32, 32>}, {pipeline_mode = #tpu.pipeline_mode<synchronous>, transform_indices = @transform_5, window_bounds = array<i64: 32, 32>}, {pipeline_mode = #tpu.pipeline_mode<synchronous>, transform_indices = @transform_6, window_bounds = array<i64: 32, 32>}, {pipeline_mode = #tpu.pipeline_mode<synchronous>, transform_indices = @transform_7, window_bounds = array<i64: 1, 32>}, {pipeline_mode = #tpu.pipeline_mode<synchronous>, transform_indices = @transform_8, window_bounds = array<i64: 1, 32>}, {pipeline_mode = #tpu.pipeline_mode<synchronous>, transform_indices = @transform_9, window_bounds = array<i64: 1, 32>}, {pipeline_mode = #tpu.pipeline_mode<synchronous>, transform_indices = @transform_10, window_bounds = array<i64: 1, 32>}, {transform_indices = @transform_11, window_bounds = array<i64: 2, 32>}]} {
    %c0 = arith.constant 0 : index
    %c0_0 = arith.constant 0 : index
    %c0_1 = arith.constant 0 : index
    %0 = vector.load %arg1[%c0, %c0_0, %c0_1] : memref<2x8x32xbf16, #tpu.memory_space<vmem>>, vector<2x8x32xbf16>
    %c0_2 = arith.constant 0 : index
    %c0_3 = arith.constant 0 : index
    %1 = vector.load %arg2[%c0_2, %c0_3] : memref<2x32xbf16, #tpu.memory_space<vmem>>, vector<2x32xbf16>
    %c0_4 = arith.constant 0 : index
    %c0_5 = arith.constant 0 : index
    %2 = vector.load %arg3[%c0_4, %c0_5] : memref<2x32xbf16, #tpu.memory_space<vmem>>, vector<2x32xbf16>
    %c0_6 = arith.constant 0 : index
    %c0_7 = arith.constant 0 : index
    %3 = vector.load %arg11[%c0_6, %c0_7] : memref<1x32xf32, #tpu.memory_space<vmem>>, vector<1x32xf32>
    %c0_8 = arith.constant 0 : index
    %c0_9 = arith.constant 0 : index
    %4 = vector.load %arg5[%c0_8, %c0_9] : memref<32x32xbf16, #tpu.memory_space<vmem>>, vector<32x32xbf16>
    %cst = arith.constant dense<0.000000e+00> : vector<2x32xf32>
    %5 = tpu.matmul %1, %4, %cst {dimension_numbers = #tpu.dot_dimension_numbers<[1], [0], [0], [1], [0, 0, 1, 1], [], []>} : vector<2x32xbf16>, vector<32x32xbf16>, vector<2x32xf32> -> vector<2x32xf32>
    %6 = vector.shape_cast %0 : vector<2x8x32xbf16> to vector<16x32xbf16>
    %c0_10 = arith.constant 0 : index
    %c0_11 = arith.constant 0 : index
    %7 = vector.load %arg4[%c0_10, %c0_11] : memref<32x32xbf16, #tpu.memory_space<vmem>>, vector<32x32xbf16>
    %cst_12 = arith.constant dense<0.000000e+00> : vector<16x32xf32>
    %8 = tpu.matmul %6, %7, %cst_12 {dimension_numbers = #tpu.dot_dimension_numbers<[1], [0], [0], [1], [0, 0, 1, 1], [], []>} : vector<16x32xbf16>, vector<32x32xbf16>, vector<16x32xf32> -> vector<16x32xf32>
    %9 = vector.shape_cast %8 : vector<16x32xf32> to vector<2x8x32xf32>
    %c0_13 = arith.constant 0 : index
    %c0_14 = arith.constant 0 : index
    %10 = vector.load %arg6[%c0_13, %c0_14] : memref<32x32xbf16, #tpu.memory_space<vmem>>, vector<32x32xbf16>
    %cst_15 = arith.constant dense<0.000000e+00> : vector<2x32xf32>
    %11 = tpu.matmul %2, %10, %cst_15 {dimension_numbers = #tpu.dot_dimension_numbers<[1], [0], [0], [1], [0, 0, 1, 1], [], []>} : vector<2x32xbf16>, vector<32x32xbf16>, vector<2x32xf32> -> vector<2x32xf32>
    %c0_16 = arith.constant 0 : index
    %c0_17 = arith.constant 0 : index
    %12 = vector.load %arg8[%c0_16, %c0_17] : memref<1x32xf32, #tpu.memory_space<vmem>>, vector<1x32xf32>
    %13 = vector.broadcast %12 : vector<1x32xf32> to vector<2x32xf32>
    %14 = arith.addf %5, %13 : vector<2x32xf32>
    %15 = vector.shape_cast %14 : vector<2x32xf32> to vector<2x1x32xf32>
    %16 = vector.broadcast %15 : vector<2x1x32xf32> to vector<2x8x32xf32>
    %17 = arith.addf %16, %9 : vector<2x8x32xf32>
    %cst_18 = arith.constant 0.000000e+00 : f32
    %18 = vector.broadcast %cst_18 : f32 to vector<2x8x32xf32>
    %19 = arith.maximumf %17, %18 : vector<2x8x32xf32>
    %20 = vector.shape_cast %3 : vector<1x32xf32> to vector<1x1x32xf32>
    %21 = vector.broadcast %20 : vector<1x1x32xf32> to vector<2x8x32xf32>
    %22 = arith.mulf %19, %21 : vector<2x8x32xf32>
    %cst_19 = arith.constant dense<0.000000e+00> : vector<2x8xf32>
    %23 = vector.multi_reduction <add>, %22, %cst_19 [2] : vector<2x8x32xf32> to vector<2x8xf32>
    %24 = arith.addf %5, %11 : vector<2x32xf32>
    %c0_20 = arith.constant 0 : index
    %c0_21 = arith.constant 0 : index
    %25 = vector.load %arg9[%c0_20, %c0_21] : memref<1x32xf32, #tpu.memory_space<vmem>>, vector<1x32xf32>
    %26 = vector.broadcast %25 : vector<1x32xf32> to vector<2x32xf32>
    %27 = arith.addf %24, %26 : vector<2x32xf32>
    %cst_22 = arith.constant 0.000000e+00 : f32
    %28 = vector.broadcast %cst_22 : f32 to vector<2x32xf32>
    %29 = arith.maximumf %27, %28 : vector<2x32xf32>
    %30 = vector.broadcast %3 : vector<1x32xf32> to vector<2x32xf32>
    %31 = arith.mulf %29, %30 : vector<2x32xf32>
    %cst_23 = arith.constant dense<0.000000e+00> : vector<2xf32>
    %32 = vector.multi_reduction <add>, %31, %cst_23 [1] : vector<2x32xf32> to vector<2xf32>
    %33 = vector.shape_cast %32 : vector<2xf32> to vector<2x1xf32>
    %cst_24 = arith.constant dense<0xFF800000> : vector<2xf32>
    %34 = vector.multi_reduction <maximumf>, %23, %cst_24 [1] : vector<2x8xf32> to vector<2xf32>
    %35 = vector.shape_cast %34 : vector<2xf32> to vector<2x1xf32>
    %36 = arith.maximumf %35, %33 : vector<2x1xf32>
    %37 = vector.broadcast %36 : vector<2x1xf32> to vector<2x8xf32>
    %38 = arith.subf %23, %37 : vector<2x8xf32>
    %39 = math.exp %38 : vector<2x8xf32>
    %40 = arith.subf %33, %36 : vector<2x1xf32>
    %41 = math.exp %40 : vector<2x1xf32>
    %cst_25 = arith.constant dense<0.000000e+00> : vector<2xf32>
    %42 = vector.multi_reduction <add>, %39, %cst_25 [1] : vector<2x8xf32> to vector<2xf32>
    %43 = vector.shape_cast %42 : vector<2xf32> to vector<2x1xf32>
    %44 = arith.addf %43, %41 : vector<2x1xf32>
    %45 = tpu.reciprocal %44 {approx = true} : vector<2x1xf32> -> vector<2x1xf32>
    %46 = vector.broadcast %45 : vector<2x1xf32> to vector<2x8xf32>
    %47 = arith.mulf %39, %46 : vector<2x8xf32>
    %48 = arith.mulf %41, %45 : vector<2x1xf32>
    %49 = arith.extf %2 : vector<2x32xbf16> to vector<2x32xf32>
    %50 = vector.broadcast %48 : vector<2x1xf32> to vector<2x32xf32>
    %51 = arith.mulf %49, %50 : vector<2x32xf32>
    %52 = arith.truncf %51 : vector<2x32xf32> to vector<2x32xbf16>
    %c0_26 = arith.constant 0 : index
    %c0_27 = arith.constant 0 : index
    %53 = vector.load %arg7[%c0_26, %c0_27] : memref<32x32xbf16, #tpu.memory_space<vmem>>, vector<32x32xbf16>
    %cst_28 = arith.constant dense<0.000000e+00> : vector<2x32xf32>
    %54 = tpu.matmul %52, %53, %cst_28 {dimension_numbers = #tpu.dot_dimension_numbers<[1], [0], [0], [1], [0, 0, 1, 1], [], []>} : vector<2x32xbf16>, vector<32x32xbf16>, vector<2x32xf32> -> vector<2x32xf32>
    %c0_29 = arith.constant 0 : index
    %c0_30 = arith.constant 0 : index
    %55 = vector.load %arg10[%c0_29, %c0_30] : memref<1x32xf32, #tpu.memory_space<vmem>>, vector<1x32xf32>
    %56 = vector.broadcast %55 : vector<1x32xf32> to vector<2x32xf32>
    %57 = arith.addf %54, %56 : vector<2x32xf32>
    %58 = vector.shape_cast %47 : vector<2x8xf32> to vector<2x1x8xf32>
    %59 = arith.truncf %58 : vector<2x1x8xf32> to vector<2x1x8xbf16>
    "tpu.trace_start"() <{level = 10 : i32, message = "bqn,bnf->bqf"}> : () -> ()
    %cst_31 = arith.constant dense<0.000000e+00> : vector<2x1x32xf32>
    %60 = tpu.matmul %59, %0, %cst_31 {dimension_numbers = #tpu.dot_dimension_numbers<[2], [1], [1], [2], [0, 0, 0, 1, 1, 2], [0], [0]>} : vector<2x1x8xbf16>, vector<2x8x32xbf16>, vector<2x1x32xf32> -> vector<2x1x32xf32>
    "tpu.trace_stop"() : () -> ()
    %61 = vector.shape_cast %60 : vector<2x1x32xf32> to vector<2x32xf32>
    %62 = arith.addf %61, %57 : vector<2x32xf32>
    %c0_32 = arith.constant 0 : index
    %c0_33 = arith.constant 0 : index
    %63 = vector.load %arg12[%c0_32, %c0_33] : memref<2x32xf32, #tpu.memory_space<vmem>>, vector<2x32xf32>
    tpu.vector_store %arg12[%c0_32, %c0_33], %62 {strides = array<i32>} : memref<2x32xf32, #tpu.memory_space<vmem>>, vector<2x32xf32>,
    return
  }
  func.func @transform_0(%arg0: i32) -> (i32, i32, i32) {
    %c0_i32 = arith.constant 0 : i32
    %c0_i32_0 = arith.constant 0 : i32
    %c0_i32_1 = arith.constant 0 : i32
    return %arg0, %c0_i32, %c0_i32_0 : i32, i32, i32
  }
  func.func @transform_1(%arg0: i32) -> (i32, i32) {
    %c0_i32 = arith.constant 0 : i32
    %c0_i32_0 = arith.constant 0 : i32
    return %arg0, %c0_i32 : i32, i32
  }
  func.func @transform_2(%arg0: i32) -> (i32, i32) {
    %c0_i32 = arith.constant 0 : i32
    %c0_i32_0 = arith.constant 0 : i32
    return %arg0, %c0_i32 : i32, i32
  }
  func.func @transform_3(%arg0: i32) -> (i32, i32) {
    %c0_i32 = arith.constant 0 : i32
    %c0_i32_0 = arith.constant 0 : i32
    %c0_i32_1 = arith.constant 0 : i32
    return %c0_i32, %c0_i32_0 : i32, i32
  }
  func.func @transform_4(%arg0: i32) -> (i32, i32) {
    %c0_i32 = arith.constant 0 : i32
    %c0_i32_0 = arith.constant 0 : i32
    %c0_i32_1 = arith.constant 0 : i32
    return %c0_i32, %c0_i32_0 : i32, i32
  }
  func.func @transform_5(%arg0: i32) -> (i32, i32) {
    %c0_i32 = arith.constant 0 : i32
    %c0_i32_0 = arith.constant 0 : i32
    %c0_i32_1 = arith.constant 0 : i32
    return %c0_i32, %c0_i32_0 : i32, i32
  }
  func.func @transform_6(%arg0: i32) -> (i32, i32) {
    %c0_i32 = arith.constant 0 : i32
    %c0_i32_0 = arith.constant 0 : i32
    %c0_i32_1 = arith.constant 0 : i32
    return %c0_i32, %c0_i32_0 : i32, i32
  }
  func.func @transform_7(%arg0: i32) -> (i32, i32) {
    %c0_i32 = arith.constant 0 : i32
    %c0_i32_0 = arith.constant 0 : i32
    %c0_i32_1 = arith.constant 0 : i32
    return %c0_i32, %c0_i32_0 : i32, i32
  }
  func.func @transform_8(%arg0: i32) -> (i32, i32) {
    %c0_i32 = arith.constant 0 : i32
    %c0_i32_0 = arith.constant 0 : i32
    %c0_i32_1 = arith.constant 0 : i32
    return %c0_i32, %c0_i32_0 : i32, i32
  }
  func.func @transform_9(%arg0: i32) -> (i32, i32) {
    %c0_i32 = arith.constant 0 : i32
    %c0_i32_0 = arith.constant 0 : i32
    %c0_i32_1 = arith.constant 0 : i32
    return %c0_i32, %c0_i32_0 : i32, i32
  }
  func.func @transform_10(%arg0: i32) -> (i32, i32) {
    %c0_i32 = arith.constant 0 : i32
    %c0_i32_0 = arith.constant 0 : i32
    %c0_i32_1 = arith.constant 0 : i32
    return %c0_i32, %c0_i32_0 : i32, i32
  }
  func.func @transform_11(%arg0: i32) -> (i32, i32) {
    %c0_i32 = arith.constant 0 : i32
    %c0_i32_0 = arith.constant 0 : i32
    return %arg0, %c0_i32 : i32, i32
  }
}

</mosaic_0001>

<bundles_post_ra>
// kernel: tpu_custom_call.1
= control target key start
LH: loop header
LB: loop body
LE: loop exit
PB: predicated region body
PF: predicated region fallthrough
CT: control target
= control target key end

     0   :  { %16 = vsyncpa [#allocation3], 0  ;;  %s1090_s0 = inlined_call_operand.hbm [shape: bf16[2,8,32], index: 0, kind: input, shape index: {}]   ;;  %s1091_s1 = inlined_call_operand.vmem [shape: bf16[2,32], index: 1, kind: input, shape index: {}]   ;;  %s1092_s2 = inlined_call_operand.vmem [shape: bf16[2,32], index: 2, kind: input, shape index: {}]   ;;  %s1093_s3 = inlined_call_operand.hbm [shape: bf16[32,32], index: 3, kind: input, shape index: {}]   ;;  %s1094_s4 = inlined_call_operand.hbm [shape: bf16[32,32], index: 4, kind: input, shape index: {}]   ;;  %s1095_s5 = inlined_call_operand.hbm [shape: bf16[32,32], index: 5, kind: input, shape index: {}]   ;;  %s1096_s6 = inlined_call_operand.hbm [shape: bf16[32,32], index: 6, kind: input, shape index: {}]   ;;  %s1097_s7 = inlined_call_operand.vmem [shape: f32[1,32], index: 7, kind: input, shape index: {}]   ;;  %s1098_s8 = inlined_call_operand.vmem [shape: f32[1,32], index: 8, kind: input, shape index: {}]   ;;  %s1099_s9 = inlined_call_operand.vmem [shape: f32[1,32], index: 9, kind: input, shape index: {}]   ;;  %s1100_s10 = inlined_call_operand.vmem [shape: f32[1,32], index: 10, kind: input, shape index: {}]   ;;  %s1101_s11 = inlined_call_operand.hbm [shape: f32[2,32], index: 11, kind: output, shape index: {}]  }
   0x1   :  { %17 = vsyncpa [#allocation6], 0 }
   0x2   :  { %18 = vsyncpa [#allocation9], 0 }
   0x3   :  { %19 = vsyncpa [#allocation4], 0  ;;  %s900_s17 = smov [#allocation5]   ;;  %s901_s19 = smov [#allocation8]  }
   0x4   :  { %s41_s18 = sshll.u32 %s900_s17, 4  ;;  %s65_s20 = sshll.u32 %s901_s19, 4  ;;  %s42_s18 = int_to_ptr.vmem [resolvable:$true] %s41_s18  ;;  %s66_s20 = int_to_ptr.vmem [resolvable:$true] %s65_s20 }
   0x5   :  { %s780_s21 = scalar_lea.vmem %s42_s18, 256  ;;  %p785_p1 = scmp.lt.s32.totalorder %s42_s18, %s42_s18 }
   0x6   :  { %p781_p0 = scmp.ne.s32.totalorder %s42_s18, %s780_s21  ;;  %p786_p2 = scmp.lt.s32.totalorder %s780_s21, %s780_s21 }
   0x8   :  { %p787_p3 = por %p786_p2, %p785_p1 }
   0xa   :  { %p788_p4 = pnand %p787_p3, %p781_p0 }
   0xc   :  { %791 = shalt.err (!%p788_p4)
}
   0xd   :  { %s902_s22 = smov 64   ;;  %s903_s23 = smov 4  }
   0xe   :  { %47 = dma.hbm_to_vmem [thread:$0]  %s1093_s3, 256, %s42_s18, [#allocation6], %s902_s22, %s902_s22, %s903_s23  }
   0xf   :  { %s800_s26 = scalar_lea.vmem %s66_s20, 256  ;;  %p805_p6 = scmp.lt.s32.totalorder %s66_s20, %s66_s20 }
  0x10   :  { %p801_p5 = scmp.ne.s32.totalorder %s66_s20, %s800_s26  ;;  %p806_p7 = scmp.lt.s32.totalorder %s800_s26, %s800_s26 }
  0x12   :  { %p807_p8 = por %p806_p7, %p805_p6 }
  0x14   :  { %p808_p9 = pnand %p807_p8, %p801_p5 }
  0x16   :  { %811 = shalt.err (!%p808_p9)
}
  0x17   :  { %71 = dma.hbm_to_vmem [thread:$0]  %s1095_s5, 256, %s66_s20, [#allocation9], %s902_s22, %s902_s22, %s903_s23  }
  0x18   :  { %s904_s29 = smov [#allocation2]   ;;  %s905_s12 = smov [#allocation7]  }
  0x19   :  { %s25_s30 = sshll.u32 %s904_s29, 4  ;;  %s53_s13 = sshll.u32 %s905_s12, 4  ;;  %s26_s30 = int_to_ptr.vmem [resolvable:$true] %s25_s30  ;;  %s54_s13 = int_to_ptr.vmem [resolvable:$true] %s53_s13 }
  0x1a   :  { %s820_s3 = scalar_lea.vmem %s26_s30, 128  ;;  %p825_p11 = scmp.lt.s32.totalorder %s26_s30, %s26_s30 }
  0x1b   :  { %p821_p10 = scmp.ne.s32.totalorder %s26_s30, %s820_s3  ;;  %p826_p12 = scmp.lt.s32.totalorder %s820_s3, %s820_s3 }
  0x1d   :  { %p827_p13 = por %p826_p12, %p825_p11 }
  0x1f   :  { %p828_p0 = pnand %p827_p13, %p821_p10 }
  0x21   :  { %831 = shalt.err (!%p828_p0)
}
  0x22   :  { %31 = dma.hbm_to_vmem [thread:$0]  %s1090_s0, 128, %s26_s30, [#allocation3], %s902_s22, %s902_s22, %s903_s23  }
  0x23   :  { %s840_s5 = scalar_lea.vmem %s54_s13, 256  ;;  %p845_p2 = scmp.lt.s32.totalorder %s54_s13, %s54_s13 }
  0x24   :  { %p841_p1 = scmp.ne.s32.totalorder %s54_s13, %s840_s5  ;;  %p846_p3 = scmp.lt.s32.totalorder %s840_s5, %s840_s5 }
  0x26   :  { %p847_p4 = por %p846_p3, %p845_p2 }
  0x28   :  { %p848_p5 = pnand %p847_p4, %p841_p1 }
  0x2a   :  { %851 = shalt.err (!%p848_p5)
}
  0x2b   :  { %59 = dma.hbm_to_vmem [thread:$0]  %s1094_s4, 256, %s54_s13, [#allocation6], %s902_s22, %s902_s22, %s903_s23  }
  0x2c   :  { %s906_s18 = smov [#allocation10]  }
  0x2d   :  { %s77_s19 = sshll.u32 %s906_s18, 4  ;;  %s78_s19 = int_to_ptr.vmem [resolvable:$true] %s77_s19 }
  0x2e   :  { %s860_s20 = scalar_lea.vmem %s78_s19, 256  ;;  %p865_p7 = scmp.lt.s32.totalorder %s78_s19, %s78_s19 }
  0x2f   :  { %p861_p6 = scmp.ne.s32.totalorder %s78_s19, %s860_s20  ;;  %p866_p8 = scmp.lt.s32.totalorder %s860_s20, %s860_s20 }
  0x31   :  { %p867_p9 = por %p866_p8, %p865_p7 }
  0x33   :  { %p868_p10 = pnand %p867_p9, %p861_p6 }
  0x35   :  { %871 = shalt.err (!%p868_p10)
}
  0x36   :  { %83 = dma.hbm_to_vmem [thread:$0]  %s1096_s6, 256, %s78_s19, [#allocation9], %s902_s22, %s902_s22, %s903_s23  }
  0x37   :  { %892 = dma.done.wait [#allocation3], 128  }
  0x38   :  { %893 = vsyncadd [#allocation3], 4294967168 }
  0x39   :  { %894 = dma.done.wait [#allocation6], 512  }
  0x3a   :  { %895 = vsyncadd [#allocation6], 4294966784 }
  0x3b   :  { %896 = dma.done.wait [#allocation9], 512  }
  0x3c   :  { %897 = vsyncadd [#allocation9], 4294966784  ;;  %v907_v0 = vmov 0.0   ;;  %vm908_vm0 = vmmov 0   ;;  %v755_v1 = vld [vmem:[#allocation7 + $0x8] sm:$0xff]   ;;  %v756_v2 = vld [vmem:[#allocation5 + $0x8] sm:$0xff]   ;;  %v309_v14 = vlaneseq }
  0x3d   :  { %697 = vmatprep.subr.bf16.mxu0 %v907_v0  ;;  %705 = vmatprep.subr.bf16.mxu1 %v907_v0  ;;  %v757_v3 = vld [vmem:[#allocation7] sm:$0xff]   ;;  %v758_v4 = vld [vmem:[#allocation5] sm:$0xff]   ;;  %v110_v5 = vld [vmem:[%s1091_s1] sm:$0x1]  ;;  %vm129_vm1 = vcmask 261120   ;;  %vm367_vm2 = vcmask 254976  }
  0x3e   :  { %701 = vmatprep.mubr.msk.bf16.mxu0 %vm908_vm0, %v907_v0  ;;  %709 = vmatprep.mubr.msk.bf16.mxu1 %vm908_vm0, %v907_v0  ;;  %v1013_v6 = vld [vmem:[#allocation2] sm:$0xf]  ;;  %v1015_v7 = vld [vmem:[#allocation2 + $0x4] sm:$0xf]  ;;  %v759_v8 = vld [vmem:[#allocation8 + $0x8] sm:$0xff]   ;;  %v1038_v16 = vshrl.u32 %v309_v14, 7 }
  0x3f   :  { %698 = vmatpush3.bf16.msra.mxu0 %v755_v1  ;;  %706 = vmatpush3.bf16.msra.mxu1 %v756_v2  ;;  %v665_v9 = vcombine.low %v1013_v6, %v1015_v7  ;;  %v761_v10 = vld [vmem:[#allocation8] sm:$0xff]   ;;  %v1031_v11 = vld [vmem:[%s1092_s2] sm:$0x1]  ;;  %v909_v12 = vmov 1966171168   ;;  %v374_v54 = vand.u32 127, %v309_v14 }
  0x40   :  { %699 = vmatprep.subr.bf16.mxu0 %v907_v0  ;;  %707 = vmatprep.subr.bf16.mxu1 %v907_v0  ;;  %v307_v13 = vunpack.c.l.s4 %v909_v12  ;;  %v672_v17 = vld [vmem:[%s1097_s7] ss:$0 sm:$0xff]  ;;  %v1045_v24 = vsub.s32 0, %v1038_v16  ;;  %vm383_vm3 = vcmask 1041409   ;;  %vm386_vm4 = vcmask 58368   ;;  %s911_s27 = smov [#allocation11]  }
  0x41   :  { %v674_v35 = vld [vmem:[%s1098_s8] ss:$0 sm:$0xff]  ;;  %v1059_v56 = vsub.s32 %v374_v54, %v1038_v16  ;;  %v910_v62 = vmov 0   ;;  %v398_v1 = vsub.s32 1, %v1038_v16  ;;  %vm533_vm5 = vcmask 1043456   ;;  %s651_s28 = sshll.u32 %s911_s27, 4  ;;  %s652_s28 = int_to_ptr.vmem [resolvable:$true] %s651_s28 }
  0x42   :  { %v308_v15 = vunpack.c.0.s8 %v307_v13  ;;  %v673_v39 = vld [vmem:[%s1100_s10] ss:$0 sm:$0xff]  ;;  %754 = vset.pattern.permute.xlu1 %v910_v62  ;;  %753 = vset.pattern.permute.xlu0 %v910_v62  ;;  %vm529_vm6 = vcmask 64512   ;;  %p877_p12 = scmp.lt.s32.totalorder %s652_s28, %s652_s28 }
  0x43   :  { %700 = vmatpush3.bf16.msra.mxu0 %v757_v3  ;;  %708 = vmatpush3.bf16.msra.mxu1 %v758_v4 }
  0x44   :  { %713 = vmatprep.subr.bf16.mxu0 %v907_v0  ;;  %721 = vmatprep.subr.bf16.mxu1 %v907_v0  ;;  %v311_v18 = vsub.s32 %v308_v15, %v1038_v16 }
  0x46   :  { %702 = vmatmul.mubr.msk.bf16.vlgmr.msra.gmra.mxu0 %vm129_vm1, %v110_v5  ;;  %710 = vmatmul.mubr.msk.bf16.vlgmr.msra.gmra.mxu1 %vm129_vm1, %v665_v9 }
  0x47   :  { %714 = vmatpush3.bf16.msra.mxu0 %v759_v8  ;;  %717 = vmatprep.mubr.msk.bf16.mxu0 %vm908_vm0, %v907_v0 }
  0x48   :  { %715 = vmatprep.subr.bf16.mxu0 %v907_v0  ;;  %725 = vmatprep.mubr.msk.bf16.mxu1 %vm908_vm0, %v907_v0 }
  0x4b   :  { %716 = vmatpush3.bf16.msra.mxu0 %v761_v10 }
  0x4c   :  { %729 = vmatprep.subr.bf16.mxu0 %v907_v0 }
  0x4e   :  { %718 = vmatmul.mubr.msk.bf16.vlgmr.msra.gmra.mxu0 %vm129_vm1, %v1031_v11 }
  0x4f   :  { %731 = vmatprep.mubr.msk.bf16.mxu0 %vm908_vm0, %v907_v0 }
 0x106   :  { %v167_v19 = vpop.f32.mrf.mxu0  ;;  %v231_v21 = vpop.f32.mrf.mxu1 }
 0x107   :  { %v304_v20 = vadd.f32 %v672_v17, %v167_v19 }
 0x108   :  { %v703_v22 = vpop.f32.mrf.mxu0  ;;  %v711_v25 = vpop.f32.mrf.mxu1 }
 0x109   :  { %v312_v23 = vrot.slane %v304_v20, %v311_v18  ;;  %v762_v22 = vld [vmem:[#allocation10 + $0x8] sm:$0xff]  }
 0x10a   :  { %v170_v26 = vpop.f32.mrf.mxu0  ;;  %v234_v29 = vpop.f32.mrf.mxu1  ;;  %722 = vmatpush3.bf16.msra.mxu1 %v762_v22 }
 0x10b   :  { %v313_v27 = vcombine.high %v312_v23, %v312_v23  ;;  %v320_v28 = vrot.slane %v312_v23, %v311_v18  ;;  %v763_v23 = vld [vmem:[#allocation10] sm:$0xff]   ;;  %723 = vmatprep.subr.bf16.mxu1 %v907_v0 }
 0x10c   :  { %v704_v30 = vpop.f32.mrf.mxu0  ;;  %v712_v33 = vpop.f32.mrf.mxu1 }
 0x10d   :  { %v331_v31 = vrot.slane %v320_v28, %v1045_v24  ;;  %v327_v32 = vrot.slane %v313_v27, %v311_v18 }
 0x10e   :  { %v291_v34 = vpop.f32.mrf.mxu0  ;;  %724 = vmatpush3.bf16.msra.mxu1 %v763_v23 }
 0x10f   :  { %v338_v36 = vadd.f32 %v331_v31, %v231_v21  ;;  %v335_v37 = vrot.slane %v327_v32, %v1045_v24  ;;  %v356_v38 = vadd.f32 %v291_v34, %v167_v19  ;;  %735 = vmatprep.subr.bf16.mxu1 %v907_v0 }
 0x110   :  { %v719_v40 = vpop.f32.mrf.mxu0 }
 0x111   :  { %v340_v41 = vmax.f32 %v338_v36, 0.0  ;;  %v339_v42 = vadd.f32 %v335_v37, %v234_v29  ;;  %v364_v43 = vadd.f32 %v674_v35, %v356_v38  ;;  %v448_v29 = vunpack.c.l.bf16 %v1031_v11 }
 0x112   :  { %v294_v44 = vpop.f32.mrf.mxu0 }
 0x113   :  { %v341_v45 = vmax.f32 %v339_v42, 0.0  ;;  %v365_v46 = vmax.f32 %v364_v43, 0.0  ;;  %v348_v47 = vmul.f32 %v673_v39, %v340_v41  ;;  %v535_v42 = vsel %vm533_vm5, %v1013_v6, 0 }
 0x114   :  { %v720_v48 = vpop.f32.mrf.mxu0  ;;  %730 = vmatpush3.bf16.msra.mxu0 %v535_v42 }
 0x115   :  { %v350_v49 = vsel %vm129_vm1, %v348_v47, 0.0  ;;  %v366_v50 = vmul.f32 %v673_v39, %v365_v46  ;;  %v349_v51 = vmul.f32 %v673_v39, %v341_v45  ;;  %v591_v39 = vsel %vm533_vm5, %v1015_v7, 0 }
 0x116   :  { %351 = vadd.xlane.f32.xlu0 %v350_v49 }
 0x117   :  { %v368_v52 = vsel %vm367_vm2, %v366_v50, 0.0  ;;  %v353_v53 = vsel %vm129_vm1, %v349_v51, 0.0 }
 0x118   :  { %369 = vadd.xlane.f32.xlu1 %v368_v52 }
 0x11a   :  { %354 = vadd.xlane.f32.xlu0 %v353_v53 }
 0x19f   :  { %v352_v55 = vpop.xlane.xlu0 %351 }
 0x1a0   :  { %v378_v58 = vrot.slane %v352_v55, %v1059_v56 }
 0x1a1   :  { %v370_v63 = vpop.xlane.xlu1 %369 }
 0x1a3   :  { %v355_v57 = vpop.xlane.xlu0 %354 }
 0x1a4   :  { %v382_v59 = vrot.slane %v355_v57, %v1059_v56 }
 0x1a6   :  { %v384_v60 = vsel %vm383_vm3, %v382_v59, %v378_v58 }
 0x1a7   :  { %v387_v61 = vsel %vm386_vm4, %v384_v60, -inf }
 0x1a8   :  { %388 = vmax.xlane.f32.xlu1 %v387_v61 }
 0x231   :  { %v389_v2 = vpop.xlane.xlu1 %388 }
 0x232   :  { %v390_v3 = vmax.f32 %v389_v2, %v370_v63 }
 0x234   :  { %v395_v4 = vrot.slane %v390_v3, %v1045_v24  ;;  %v399_v5 = vrot.slane %v390_v3, %v398_v1  ;;  %v408_v8 = vsub.f32 %v370_v63, %v390_v3 }
 0x236   :  { %v402_v9 = vsub.f32 %v352_v55, %v395_v4  ;;  %v403_v10 = vsub.f32 %v355_v57, %v399_v5  ;;  %v409_v25 = vmul.f32 1.442695, %v408_v8 }
 0x238   :  { %v404_v12 = vmul.f32 1.442695, %v402_v9  ;;  %v406_v13 = vmul.f32 1.442695, %v403_v10 }
 0x23a   :  { %764 = vpow2.f32 %v404_v12 }
 0x23b   :  { %766 = vpow2.f32 %v406_v13 }
 0x23c   :  { %768 = vpow2.f32 %v409_v25 }
 0x247   :  { %v765_v14 = vpop.eup %764 }
 0x248   :  { %v767_v15 = vpop.eup %766  ;;  %414 = vperm.xlu0 %753, %v765_v14  }
 0x249   :  { %417 = vperm.xlu1 %754, %v767_v15   ;;  %v769_v26 = vpop.eup %768 }
 0x2c3   :  { %v415_v17 = vpop.permute.xlu0 %414 }
 0x2c4   :  { %v418_v18 = vpop.permute.xlu1 %417  ;;  %v422_v16 = vrot.slane %v415_v17, %v1059_v56 }
 0x2c5   :  { %v426_v19 = vrot.slane %v418_v18, %v1059_v56 }
 0x2c7   :  { %v427_v20 = vsel %vm383_vm3, %v426_v19, %v422_v16 }
 0x2c8   :  { %v429_v21 = vsel %vm386_vm4, %v427_v20, 0.0 }
 0x2c9   :  { %430 = vadd.xlane.f32.xlu1 %v429_v21 }
 0x352   :  { %v431_v27 = vpop.xlane.xlu1 %430 }
 0x353   :  { %v432_v28 = vadd.f32 %v769_v26, %v431_v27 }
 0x355   :  { %770 = vrcp.f32 %v432_v28 }
 0x362   :  { %v771_v30 = vpop.eup %770 }
 0x363   :  { %v447_v31 = vmul.f32 %v771_v30, %v769_v26  ;;  %v442_v32 = vrot.slane %v771_v30, %v398_v1  ;;  %v438_v33 = vrot.slane %v771_v30, %v1045_v24 }
 0x365   :  { %v449_v34 = vmul.f32 %v448_v29, %v447_v31  ;;  %v446_v35 = vmul.f32 %v767_v15, %v442_v32  ;;  %v445_v36 = vmul.f32 %v765_v14, %v438_v33 }
 0x367   :  { %v450_v37 = vpack.c.bf16 %v449_v34, %v449_v34  ;;  %v518_v38 = vpack.c.bf16 %v446_v35, %v446_v35  ;;  %v517_v41 = vpack.c.bf16 %v445_v36, %v445_v36 }
 0x369   :  { %726 = vmatmul.mubr.msk.bf16.vlgmr.msra.gmra.mxu1 %vm129_vm1, %v450_v37  ;;  %v578_v40 = vunpack.c.l.b16 %v518_v38  ;;  %v520_v11 = vunpack.c.l.b16 %v517_v41 }
 0x36a   :  { %736 = vmatpush3.bf16.msra.mxu1 %v591_v39  ;;  %737 = vmatprep.mubr.msk.bf16.mxu1 %vm908_vm0, %v907_v0  ;;  %v675_v0 = vld [vmem:[%s1099_s9] ss:$0 sm:$0xff]  ;;  %s872_s9 = scalar_lea.vmem %s652_s28, 32 }
 0x36b   :  { %580 = vperm.xlu0 %753, %v578_v40   ;;  %p873_p11 = scmp.ne.s32.totalorder %s652_s28, %s872_s9  ;;  %p878_p13 = scmp.lt.s32.totalorder %s872_s9, %s872_s9 }
 0x36d   :  { %p879_p0 = por %p878_p13, %p877_p12 }
 0x36f   :  { %522 = vperm.xlu0 %753, %v520_v11   ;;  %p880_p1 = pnand %p879_p0, %p873_p11 }
 0x3e6   :  { %v581_v24 = vpop.permute.xlu0 %580 }
 0x3e7   :  { %v585_v43 = vrot.slane %v581_v24, %v1059_v56 }
 0x3e9   :  { %v586_v44 = vpack.c.b16 %v585_v43, %v585_v43 }
 0x3ea   :  { %v523_v7 = vpop.permute.xlu0 %522 }
 0x3eb   :  { %v527_v45 = vrot.slane %v523_v7, %v1059_v56  ;;  %738 = vmatmul.mubr.msk.bf16.vlgmr.msra.gmra.mxu1 %vm529_vm6, %v586_v44 }
 0x3ed   :  { %v528_v46 = vpack.c.b16 %v527_v45, %v527_v45 }
 0x3ef   :  { %732 = vmatmul.mubr.msk.bf16.vlgmr.msra.gmra.mxu0 %vm529_vm6, %v528_v46 }
 0x429   :  { %v511_v6 = vpop.f32.mrf.mxu1 }
 0x42a   :  { %v512_v50 = vadd.f32 %v675_v0, %v511_v6 }
 0x42b   :  { %v727_v47 = vpop.f32.mrf.mxu1 }
 0x42c   :  { %v634_v51 = vrot.slane %v512_v50, 1 }
 0x42d   :  { %v514_v48 = vpop.f32.mrf.mxu1 }
 0x42f   :  { %v728_v49 = vpop.f32.mrf.mxu1 }
 0x4ab   :  { %v627_v52 = vpop.f32.mrf.mxu1 }
 0x4ac   :  { %v638_v53 = vadd.f32 %v634_v51, %v627_v52 }
 0x4ad   :  { %v739_v54 = vpop.f32.mrf.mxu1 }
 0x4ae   :  { %v641_v57 = vrot.slane %v638_v53, 7 }
 0x4af   :  { %v571_v55 = vpop.f32.mrf.mxu0  ;;  %v630_v56 = vpop.f32.mrf.mxu1 }
 0x4b0   :  { %v637_v58 = vadd.f32 %v571_v55, %v512_v50 }
 0x4b1   :  { %v733_v59 = vpop.f32.mrf.mxu0  ;;  %v740_v60 = vpop.f32.mrf.mxu1 }
 0x4b2   :  { %v642_v61 = vsel %vm383_vm3, %v641_v57, %v637_v58 }
 0x4b3   :  { %v574_v62 = vpop.f32.mrf.mxu0  ;;  %644 = vst.msk [vmem:[#allocation11] sm:$0x3] %vm367_vm2, %v642_v61 }
 0x4b4   :  { %883 = shalt.err (!%p880_p1)
}
 0x4b5   :  { %654 = dma.vmem_to_hbm [thread:$0]  %s652_s28, 32, %s1101_s11, [#allocation4]   ;;  %v734_v63 = vpop.f32.mrf.mxu0 }
 0x4b6   :  { %898 = dma.done.wait [#allocation4], 32  }
 0x4b7   :  { %899 = vsyncadd [#allocation4], 4294967264 }
 0x4b8   :  { %658 = vsyncpa [#allocation3], 1 }
 0x4b9   :  { %659 = vsyncpa [#allocation6], 1 }
 0x4ba   :  { %660 = vsyncpa [#allocation9], 1 }
 0x4bb   :  { %661 = vsyncpa [#allocation4], 1 }

</bundles_post_ra>
